<compile_context>
chip_gen: v5e
topology: v5e:2x2
jax: 0.10.0
libtpu: 0.0.40
codegen_flags: <defaults>
</compile_context>

<pallas_src>
import functools
from typing import NamedTuple

import jax
import jax.numpy as jnp
from jax import lax
from jax.experimental import pallas as pl
from jax.experimental.pallas import tpu as pltpu

LN_EPS = 1e-5
LANES = 128
SUBLANES = 8


def _pad_to(n, m):
    return pl.cdiv(n, m) * m


class DecoderParams(NamedTuple):
    w1: jax.Array     # (in_dim_pad, out_dim_pad) bf16, zero-padded
    b1: jax.Array     # (1, out_dim_pad)  f32, zero-padded
    gamma: jax.Array  # (1, out_dim_pad)  f32, zero-padded
    beta: jax.Array   # (1, out_dim_pad)  f32, zero-padded
    w2: jax.Array     # (out_dim_pad, out_dim_pad) bf16, zero-padded
    b2: jax.Array     # (1, out_dim_pad)  f32, zero-padded


def prepare_params(w1, b1, gamma, beta, w2, b2):
    """One-time pad + bf16 cast of the decoder weights.

    Call ONCE after init / checkpoint load, not per forward call.
    INVARIANT (LayerNorm correctness): padded columns of w1 and padded lanes
    of b1/gamma/beta must be exactly zero — the kernel's unmasked mean and
    closed-form padded-variance correction rely on padded lanes of y being 0
    and padded lanes of the normalized output being 0.
    """
    in_dim, out_dim = w1.shape
    in_dim_pad = _pad_to(in_dim, LANES)
    out_dim_pad = _pad_to(out_dim, LANES)

    w1p = jnp.pad(w1.astype(jnp.bfloat16),
                  ((0, in_dim_pad - in_dim), (0, out_dim_pad - out_dim)))
    w2p = jnp.pad(w2.astype(jnp.bfloat16),
                  ((0, out_dim_pad - out_dim), (0, out_dim_pad - out_dim)))

    def row(v):  # (out_dim,) -> zero-padded (1, out_dim_pad) f32
        return jnp.pad(v.astype(jnp.float32),
                       (0, out_dim_pad - out_dim)).reshape(1, out_dim_pad)

    params = DecoderParams(w1p, row(b1), row(gamma), row(beta), w2p, row(b2))
    return params, out_dim


def _decoder_kernel(x_ref, w1_ref, b1_ref, g_ref, beta_ref, w2_ref, b2_ref,
                    o_ref, h_ref, *, out_dim, out_dim_pad):
    n = pl.program_id(1)

    # First N-tile of each row tile: Linear1 + LayerNorm + ReLU into the
    # persistent bf16 VMEM scratch (reused by every N-tile of this row tile).
    @pl.when(n == 0)
    def _():
        xb = x_ref[...].astype(jnp.bfloat16)  # per-tile cast; x stays f32 in HBM
        y = jnp.dot(xb, w1_ref[...], preferred_element_type=jnp.float32) + b1_ref[...]

        inv_n = 1.0 / out_dim
        # Padded lanes of y are exactly 0 (zero-padded W1 columns / b1), so
        # the plain lane-sum already equals the true-lane sum.
        mean = jnp.sum(y, axis=-1, keepdims=True) * inv_n
        centered = y - mean
        sq = jnp.sum(centered * centered, axis=-1, keepdims=True)
        if out_dim_pad != out_dim:
            # Padded lanes of `centered` are exactly -mean: subtract their
            # contribution instead of materializing a masked copy.
            sq = sq - (out_dim_pad - out_dim) * (mean * mean)
        var = sq * inv_n
        inv = lax.rsqrt(var + LN_EPS)                           # EUP
        y_ln = centered * (inv * g_ref[...]) + beta_ref[...]    # gamma folded into scale

        # ReLU; Dropout is eval-mode identity.
        h_ref[...] = jnp.maximum(y_ln, 0.0).astype(jnp.bfloat16)

    # Second linear on the current (out_dim_pad, tn) slab of W2.
    out = jnp.dot(h_ref[...], w2_ref[...],
                  preferred_element_type=jnp.float32) + b2_ref[...]
    o_ref[...] = out.astype(o_ref.dtype)


def _vmem_capacity_bytes():
    try:
        return int(pltpu.get_tpu_info().vmem_capacity_bytes)
    except Exception:
        return 64 * 1024 * 1024  # conservative: v7x per-TensorCore VMEM


def _choose_tm(M, tm):
    """tm must be a multiple of 8; for small M shrink it so the row grid has
    >= 2 steps (('parallel',) megacore sharding keeps both v7x cores busy)."""
    if M <= tm:
        return max(_pad_to(pl.cdiv(M, 2), SUBLANES), SUBLANES)
    return tm


@functools.partial(jax.jit, static_argnames=("out_dim", "tm", "tn"))
def linear_decoder(x, params: DecoderParams, *, out_dim, tm=256, tn=None):
    """x: (batch, seq, in_dim) f32 -> (batch, seq, out_dim) f32."""
    batch, seq, in_dim = x.shape
    in_dim_pad, out_dim_pad = params.w1.shape
    assert in_dim <= in_dim_pad and out_dim <= out_dim_pad

    M = batch * seq
    tm = _choose_tm(M, tm)
    M_pad = _pad_to(M, tm)
    m_tiles = M_pad // tm

    # N-tiling of the second matmul (stream W2 slabs) — tn=None keeps W2 resident.
    if tn is None:
        tn_eff = out_dim_pad
    else:
        tn_eff = max(_pad_to(tn, LANES), LANES)
        if out_dim_pad % tn_eff != 0:
            tn_eff = out_dim_pad  # fall back to resident W2
    n_tiles = out_dim_pad // tn_eff

    # x stays f32; only pad when actually needed (ragged rows / features).
    x2d = x.reshape(M, in_dim).astype(jnp.float32)
    if M_pad != M or in_dim_pad != in_dim:
        x2d = jnp.pad(x2d, ((0, M_pad - M), (0, in_dim_pad - in_dim)))

    # Single-buffer grid-invariant operands (constant index_map -> never
    # re-fetched); double-buffer W2/b2 only when they actually vary with n.
    resident = pl.Buffered(1)
    w2_mode = pl.Buffered(1) if n_tiles == 1 else pl.Buffered(2)

    # VMEM budget derived from the actual buffers (+ headroom for the f32
    # y/centered temporaries), clamped under the physical per-core capacity.
    need = (2 * tm * in_dim_pad * 4                                   # x tile (f32, 2 bufs)
            + in_dim_pad * out_dim_pad * 2                            # W1 (bf16, 1 buf)
            + (1 if n_tiles == 1 else 2) * out_dim_pad * tn_eff * 2   # W2 tile(s)
            + 6 * out_dim_pad * 4                                     # b1/gamma/beta/b2 rows
            + 2 * tm * tn_eff * 4                                     # output tile (f32, 2 bufs)
            + tm * out_dim_pad * 2                                    # h scratch (bf16)
            + 4 * tm * out_dim_pad * 4)                               # f32 temporaries
    cap = _vmem_capacity_bytes()
    vmem_limit = int(min(max(need + (8 << 20), 32 << 20), int(cap * 0.9)))

    # Advisory cost estimate (note: with megacore 'parallel' sharding each TC
    # DMAs its own copy of the resident weights, so real weight HBM reads can
    # be up to 2x this on v7x).
    flops = 2 * M_pad * in_dim_pad * out_dim_pad + 2 * M_pad * out_dim_pad * out_dim_pad
    w2_reads = 1 if n_tiles == 1 else m_tiles
    bytes_accessed = (M_pad * in_dim_pad * 4 + params.w1.size * 2
                      + params.w2.size * 2 * w2_reads
                      + 4 * out_dim_pad * 4 + M_pad * out_dim_pad * 4)
    cost = pl.CostEstimate(flops=int(flops), transcendentals=int(M_pad),
                           bytes_accessed=int(bytes_accessed))

    kernel = functools.partial(_decoder_kernel, out_dim=out_dim, out_dim_pad=out_dim_pad)

    out2d = pl.pallas_call(
        kernel,
        out_shape=jax.ShapeDtypeStruct((M_pad, out_dim_pad), x.dtype),
        grid_spec=pltpu.PrefetchScalarGridSpec(
            num_scalar_prefetch=0,
            grid=(m_tiles, n_tiles),
            in_specs=[
                pl.BlockSpec((tm, in_dim_pad), lambda m, n: (m, 0)),               # x rows
                pl.BlockSpec((in_dim_pad, out_dim_pad), lambda m, n: (0, 0),
                             pipeline_mode=resident),                              # W1
                pl.BlockSpec((1, out_dim_pad), lambda m, n: (0, 0),
                             pipeline_mode=resident),                              # b1
                pl.BlockSpec((1, out_dim_pad), lambda m, n: (0, 0),
                             pipeline_mode=resident),                              # gamma
                pl.BlockSpec((1, out_dim_pad), lambda m, n: (0, 0),
                             pipeline_mode=resident),                              # beta
                pl.BlockSpec((out_dim_pad, tn_eff), lambda m, n: (0, n),
                             pipeline_mode=w2_mode),                               # W2 slab
                pl.BlockSpec((1, tn_eff), lambda m, n: (0, n),
                             pipeline_mode=w2_mode),                               # b2 slab
            ],
            out_specs=pl.BlockSpec((tm, tn_eff), lambda m, n: (m, n)),
            scratch_shapes=[pltpu.VMEM((tm, out_dim_pad), jnp.bfloat16)],          # h (LN/ReLU)
        ),
        compiler_params=pltpu.CompilerParams(
            dimension_semantics=("parallel", "arbitrary"),
            vmem_limit_bytes=vmem_limit,
        ),
        cost_estimate=cost,
    )(x2d, params.w1, params.b1, params.gamma, params.beta, params.w2, params.b2)

    return out2d[:M, :out_dim].reshape(batch, seq, out_dim)


def init_params(key, in_dim, out_dim):
    """Deterministic parameter init matching nn.Linear / nn.LayerNorm shapes."""
    k1, k2, k3, k4 = jax.random.split(key, 4)
    bound1 = 1.0 / (in_dim ** 0.5)
    bound2 = 1.0 / (out_dim ** 0.5)
    # Linear weights stored pre-transposed: (in_features, out_features).
    w1 = jax.random.uniform(k1, (in_dim, out_dim), jnp.float32, -bound1, bound1)
    b1 = jax.random.uniform(k2, (out_dim,), jnp.float32, -bound1, bound1)
    w2 = jax.random.uniform(k3, (out_dim, out_dim), jnp.float32, -bound2, bound2)
    b2 = jax.random.uniform(k4, (out_dim,), jnp.float32, -bound2, bound2)
    gamma = jnp.ones((out_dim,), jnp.float32)
    beta = jnp.zeros((out_dim,), jnp.float32)
    return w1, b1, gamma, beta, w2, b2


def _reference(x, w1, b1, gamma, beta, w2, b2):
    y = jnp.einsum("bsi,io->bso", x, w1) + b1
    mean = jnp.mean(y, axis=-1, keepdims=True)
    var = jnp.mean((y - mean) ** 2, axis=-1, keepdims=True)
    y = (y - mean) * lax.rsqrt(var + LN_EPS) * gamma + beta
    h = jnp.maximum(y, 0.0)
    return jnp.einsum("bso,op->bsp", h, w2) + b2


def _check(batch, seq, in_dim, out_dim, seed, tm=256, tn=None):
    key = jax.random.PRNGKey(seed)
    kx, kp = jax.random.split(key)
    x = jax.random.normal(kx, (batch, seq, in_dim), jnp.float32)
    raw = init_params(kp, in_dim, out_dim)
    params, true_out_dim = prepare_params(*raw)   # one-time weight prep

    out = linear_decoder(x, params, out_dim=true_out_dim, tm=tm, tn=tn)
    out = jax.block_until_ready(out)
    ref = _reference(x, *raw)

    assert out.shape == (batch, seq, out_dim)
    # bf16 MXU operands with f32 accumulation -> loosened tolerance vs f32 ref.
    assert jnp.allclose(out, ref, atol=5e-2, rtol=5e-2), "mismatch vs reference"


if __name__ == "__main__":
    # Small shape consistent with the module (eval-mode dropout = identity).
    _check(batch=2, seq=8, in_dim=32, out_dim=32, seed=0)
    # Non-128-multiple dims, multi-row-tile grid, padded-variance correction.
    _check(batch=3, seq=100, in_dim=160, out_dim=192, seed=1)
    # N-tiled W2 path (tn < out_dim_pad): streams W2 slabs per row tile.
    _check(batch=3, seq=100, in_dim=160, out_dim=192, seed=2, tn=128)
    print("KERNEL_OK")
</pallas_src>

<mosaic_0001>
module attributes {stable_mosaic.version = 11 : i64} {
  func.func @_decoder_kernel(%arg0: i32, %arg1: i32, %arg2: memref<8x128xf32, #tpu.memory_space<vmem>>, %arg3: memref<128x128xbf16, #tpu.memory_space<vmem>>, %arg4: memref<1x128xf32, #tpu.memory_space<vmem>>, %arg5: memref<1x128xf32, #tpu.memory_space<vmem>>, %arg6: memref<1x128xf32, #tpu.memory_space<vmem>>, %arg7: memref<128x128xbf16, #tpu.memory_space<vmem>>, %arg8: memref<1x128xf32, #tpu.memory_space<vmem>>, %arg9: memref<8x128xf32, #tpu.memory_space<vmem>>, %arg10: memref<8x128xbf16, #tpu.memory_space<vmem>>) attributes {dimension_semantics = [#tpu.dimension_semantics<parallel>, #tpu.dimension_semantics<arbitrary>], iteration_bounds = array<i64: 2, 1>, scalar_prefetch = 0 : i64, scratch_operands = 1 : i64, tpu.core_type = #tpu.core_type<tc>, window_params = [{transform_indices = @transform_0, window_bounds = array<i64: 8, 128>}, {pipeline_mode = #tpu.pipeline_mode<synchronous>, transform_indices = @transform_1, window_bounds = array<i64: 128, 128>}, {pipeline_mode = #tpu.pipeline_mode<synchronous>, transform_indices = @transform_2, window_bounds = array<i64: 1, 128>}, {pipeline_mode = #tpu.pipeline_mode<synchronous>, transform_indices = @transform_3, window_bounds = array<i64: 1, 128>}, {pipeline_mode = #tpu.pipeline_mode<synchronous>, transform_indices = @transform_4, window_bounds = array<i64: 1, 128>}, {pipeline_mode = #tpu.pipeline_mode<synchronous>, transform_indices = @transform_5, window_bounds = array<i64: 128, 128>}, {pipeline_mode = #tpu.pipeline_mode<synchronous>, transform_indices = @transform_6, window_bounds = array<i64: 1, 128>}, {transform_indices = @transform_7, window_bounds = array<i64: 8, 128>}]} {
    %c0_i32 = arith.constant 0 : i32
    %0 = arith.cmpi eq, %arg1, %c0_i32 : i32
    %1 = arith.extui %0 : i1 to i32
    %c0_i32_0 = arith.constant 0 : i32
    %2 = arith.cmpi ne, %1, %c0_i32_0 : i32
    scf.if %2 {
      %c0_8 = arith.constant 0 : index
      %c0_9 = arith.constant 0 : index
      %10 = vector.load %arg2[%c0_8, %c0_9] : memref<8x128xf32, #tpu.memory_space<vmem>>, vector<8x128xf32>
      %11 = arith.truncf %10 : vector<8x128xf32> to vector<8x128xbf16>
      %c0_10 = arith.constant 0 : index
      %c0_11 = arith.constant 0 : index
      %12 = vector.load %arg3[%c0_10, %c0_11] : memref<128x128xbf16, #tpu.memory_space<vmem>>, vector<128x128xbf16>
      %cst_12 = arith.constant dense<0.000000e+00> : vector<8x128xf32>
      %13 = tpu.matmul %11, %12, %cst_12 {dimension_numbers = #tpu.dot_dimension_numbers<[1], [0], [0], [1], [0, 0, 1, 1], [], []>} : vector<8x128xbf16>, vector<128x128xbf16>, vector<8x128xf32> -> vector<8x128xf32>
      %c0_13 = arith.constant 0 : index
      %c0_14 = arith.constant 0 : index
      %14 = vector.load %arg4[%c0_13, %c0_14] : memref<1x128xf32, #tpu.memory_space<vmem>>, vector<1x128xf32>
      %15 = vector.broadcast %14 : vector<1x128xf32> to vector<8x128xf32>
      %16 = arith.addf %13, %15 : vector<8x128xf32>
      %cst_15 = arith.constant dense<0.000000e+00> : vector<8xf32>
      %17 = vector.multi_reduction <add>, %16, %cst_15 [1] : vector<8x128xf32> to vector<8xf32>
      %18 = vector.shape_cast %17 : vector<8xf32> to vector<8x1xf32>
      %cst_16 = arith.constant 3.125000e-02 : f32
      %19 = vector.broadcast %cst_16 : f32 to vector<8x1xf32>
      %20 = arith.mulf %18, %19 : vector<8x1xf32>
      %21 = vector.broadcast %20 : vector<8x1xf32> to vector<8x128xf32>
      %22 = arith.subf %16, %21 : vector<8x128xf32>
      %23 = arith.mulf %22, %22 : vector<8x128xf32>
      %cst_17 = arith.constant dense<0.000000e+00> : vector<8xf32>
      %24 = vector.multi_reduction <add>, %23, %cst_17 [1] : vector<8x128xf32> to vector<8xf32>
      %25 = vector.shape_cast %24 : vector<8xf32> to vector<8x1xf32>
      %26 = arith.mulf %20, %20 : vector<8x1xf32>
      %cst_18 = arith.constant 9.600000e+01 : f32
      %27 = vector.broadcast %cst_18 : f32 to vector<8x1xf32>
      %28 = arith.mulf %27, %26 : vector<8x1xf32>
      %29 = arith.subf %25, %28 : vector<8x1xf32>
      %cst_19 = arith.constant 3.125000e-02 : f32
      %30 = vector.broadcast %cst_19 : f32 to vector<8x1xf32>
      %31 = arith.mulf %29, %30 : vector<8x1xf32>
      %cst_20 = arith.constant 9.99999974E-6 : f32
      %32 = vector.broadcast %cst_20 : f32 to vector<8x1xf32>
      %33 = arith.addf %31, %32 : vector<8x1xf32>
      %34 = math.rsqrt %33 : vector<8x1xf32>
      %c0_21 = arith.constant 0 : index
      %c0_22 = arith.constant 0 : index
      %35 = vector.load %arg5[%c0_21, %c0_22] : memref<1x128xf32, #tpu.memory_space<vmem>>, vector<1x128xf32>
      %36 = vector.broadcast %34 : vector<8x1xf32> to vector<8x128xf32>
      %37 = vector.broadcast %35 : vector<1x128xf32> to vector<8x128xf32>
      %38 = arith.mulf %36, %37 : vector<8x128xf32>
      %39 = arith.mulf %22, %38 : vector<8x128xf32>
      %c0_23 = arith.constant 0 : index
      %c0_24 = arith.constant 0 : index
      %40 = vector.load %arg6[%c0_23, %c0_24] : memref<1x128xf32, #tpu.memory_space<vmem>>, vector<1x128xf32>
      %41 = vector.broadcast %40 : vector<1x128xf32> to vector<8x128xf32>
      %42 = arith.addf %39, %41 : vector<8x128xf32>
      %cst_25 = arith.constant 0.000000e+00 : f32
      %43 = vector.broadcast %cst_25 : f32 to vector<8x128xf32>
      %44 = arith.maximumf %42, %43 : vector<8x128xf32>
      %45 = arith.truncf %44 : vector<8x128xf32> to vector<8x128xbf16>
      %c0_26 = arith.constant 0 : index
      %c0_27 = arith.constant 0 : index
      %46 = vector.load %arg10[%c0_26, %c0_27] : memref<8x128xbf16, #tpu.memory_space<vmem>>, vector<8x128xbf16>
      tpu.vector_store %arg10[%c0_26, %c0_27], %45 {strides = array<i32>} : memref<8x128xbf16, #tpu.memory_space<vmem>>, vector<8x128xbf16>,
    } else {
    }
    %c0 = arith.constant 0 : index
    %c0_1 = arith.constant 0 : index
    %3 = vector.load %arg10[%c0, %c0_1] : memref<8x128xbf16, #tpu.memory_space<vmem>>, vector<8x128xbf16>
    %c0_2 = arith.constant 0 : index
    %c0_3 = arith.constant 0 : index
    %4 = vector.load %arg7[%c0_2, %c0_3] : memref<128x128xbf16, #tpu.memory_space<vmem>>, vector<128x128xbf16>
    %cst = arith.constant dense<0.000000e+00> : vector<8x128xf32>
    %5 = tpu.matmul %3, %4, %cst {dimension_numbers = #tpu.dot_dimension_numbers<[1], [0], [0], [1], [0, 0, 1, 1], [], []>} : vector<8x128xbf16>, vector<128x128xbf16>, vector<8x128xf32> -> vector<8x128xf32>
    %c0_4 = arith.constant 0 : index
    %c0_5 = arith.constant 0 : index
    %6 = vector.load %arg8[%c0_4, %c0_5] : memref<1x128xf32, #tpu.memory_space<vmem>>, vector<1x128xf32>
    %7 = vector.broadcast %6 : vector<1x128xf32> to vector<8x128xf32>
    %8 = arith.addf %5, %7 : vector<8x128xf32>
    %c0_6 = arith.constant 0 : index
    %c0_7 = arith.constant 0 : index
    %9 = vector.load %arg9[%c0_6, %c0_7] : memref<8x128xf32, #tpu.memory_space<vmem>>, vector<8x128xf32>
    tpu.vector_store %arg9[%c0_6, %c0_7], %8 {strides = array<i32>} : memref<8x128xf32, #tpu.memory_space<vmem>>, vector<8x128xf32>,
    return
  }
  func.func @transform_0(%arg0: i32, %arg1: i32) -> (i32, i32) {
    %c0_i32 = arith.constant 0 : i32
    %c0_i32_0 = arith.constant 0 : i32
    return %arg0, %c0_i32 : i32, i32
  }
  func.func @transform_1(%arg0: i32, %arg1: i32) -> (i32, i32) {
    %c0_i32 = arith.constant 0 : i32
    %c0_i32_0 = arith.constant 0 : i32
    %c0_i32_1 = arith.constant 0 : i32
    return %c0_i32, %c0_i32_0 : i32, i32
  }
  func.func @transform_2(%arg0: i32, %arg1: i32) -> (i32, i32) {
    %c0_i32 = arith.constant 0 : i32
    %c0_i32_0 = arith.constant 0 : i32
    %c0_i32_1 = arith.constant 0 : i32
    return %c0_i32, %c0_i32_0 : i32, i32
  }
  func.func @transform_3(%arg0: i32, %arg1: i32) -> (i32, i32) {
    %c0_i32 = arith.constant 0 : i32
    %c0_i32_0 = arith.constant 0 : i32
    %c0_i32_1 = arith.constant 0 : i32
    return %c0_i32, %c0_i32_0 : i32, i32
  }
  func.func @transform_4(%arg0: i32, %arg1: i32) -> (i32, i32) {
    %c0_i32 = arith.constant 0 : i32
    %c0_i32_0 = arith.constant 0 : i32
    %c0_i32_1 = arith.constant 0 : i32
    return %c0_i32, %c0_i32_0 : i32, i32
  }
  func.func @transform_5(%arg0: i32, %arg1: i32) -> (i32, i32) {
    %c0_i32 = arith.constant 0 : i32
    %c0_i32_0 = arith.constant 0 : i32
    return %c0_i32, %arg1 : i32, i32
  }
  func.func @transform_6(%arg0: i32, %arg1: i32) -> (i32, i32) {
    %c0_i32 = arith.constant 0 : i32
    %c0_i32_0 = arith.constant 0 : i32
    return %c0_i32, %arg1 : i32, i32
  }
  func.func @transform_7(%arg0: i32, %arg1: i32) -> (i32, i32) {
    %c0_i32 = arith.constant 0 : i32
    return %arg0, %arg1 : i32, i32
  }
}

</mosaic_0001>

<bundles_post_ra>
// kernel: linear_decoder.1
= control target key start
LH: loop header
LB: loop body
LE: loop exit
PB: predicated region body
PF: predicated region fallthrough
CT: control target
= control target key end

     0   :  { %12 = vsyncpa [#allocation4], 0  ;;  %s1031_s0 = inlined_call_operand.vmem [shape: f32[16,128], index: 0, kind: input, shape index: {}]   ;;  %s1032_s1 = inlined_call_operand.hbm [shape: bf16[128,128], index: 1, kind: input, shape index: {}]   ;;  %s1033_s2 = inlined_call_operand.vmem [shape: f32[1,128], index: 2, kind: input, shape index: {}]   ;;  %s1034_s3 = inlined_call_operand.vmem [shape: f32[1,128], index: 3, kind: input, shape index: {}]   ;;  %s1035_s4 = inlined_call_operand.vmem [shape: f32[1,128], index: 4, kind: input, shape index: {}]   ;;  %s1036_s5 = inlined_call_operand.hbm [shape: bf16[128,128], index: 5, kind: input, shape index: {}]   ;;  %s1037_s6 = inlined_call_operand.vmem [shape: f32[1,128], index: 6, kind: input, shape index: {}]   ;;  %s1038_s7 = inlined_call_operand.vmem [shape: f32[16,128], index: 7, kind: output, shape index: {}]  }
   0x1   :  { %13 = vsyncpa [#allocation6], 0  ;;  %s946_s24 = smov 0   ;;  %s948_s25 = smov 0  }
   0x2   :  { %s950_s26 = smov 0  }
   0x3 LB: > { %s663_s27 = sadd.s32 4294967295, %s900_s26   ;;  %s31_s28 = sadd.s32 1, %s896_s25  ;;  %s900_s26 = sphi %s950_s26, %s19_s26   ;;  %s896_s25 = sphi %s948_s25, %s1042_s25   ;;  %s892_s24 = sphi %s946_s24, %s1041_s24  }
   0x4   : > { %p33_p0 = scmp.ge.s32.totalorder %s31_s28, 2  ;;  %p665_p1 = scmp.ge.s32.totalorder %s900_s26, 1 }
   0x5   : > { %p226_p2 = scmp.lt.s32.totalorder %s900_s26, 3  ;;  %p971_p4 = scmp.eq.s32.totalorder %s663_s27, 0 }
   0x6   : > { %s1044_s28 = smov (%p33_p0, %s31_s28), 0  ;;  %s237_s10 = sshll.u32 %s1032_s1, 4  ;;  %s238_s10 = int_to_ptr.hbm [resolvable:$true] %s237_s10 }
   0x7   : > { %p967_p3 = pnand %p665_p1, %p226_p2  ;;  %s902_s11 = smov [#allocation3]  }
   0x8   : > { %s239_s12 = sshll.u32 %s902_s11, 4  ;;  %s262_s15 = sshll.u32 %s1036_s5, 4  ;;  %s240_s12 = int_to_ptr.vmem [resolvable:$true] %s239_s12  ;;  %s263_s15 = int_to_ptr.hbm [resolvable:$true] %s262_s15 }
   0x9   : > { %p765_p5 = pneg %p967_p3  ;;  %s903_s16 = smov 64  }
   0xa   : > { %s904_s17 = smov 4   ;;  %s905_s18 = smov [#allocation5]  }
   0xb   : > { %p766_p6 = pnand %p971_p4, %p765_p5  ;;  %s264_s19 = sshll.u32 %s905_s18, 4  ;;  %s265_s19 = int_to_ptr.vmem [resolvable:$true] %s264_s19 }
   0xc   : > { %293 = sbr.rel (%p967_p3) target bundleno = 594 (0x252), region = 48 }
   0xd   : > { %768 = dma.hbm_to_vmem [thread:$0]  (!%p766_p6), %s238_s10, 1024, %s240_s12, [#allocation4], %s903_s16, %s903_s16, %s904_s17  }
   0xe   : > { %771 = dma.hbm_to_vmem [thread:$0]  (!%p766_p6), %s263_s15, 1024, %s265_s19, [#allocation6], %s903_s16, %s903_s16, %s904_s17  }
  0x11   : > { %883 = dma.done.wait (%p971_p4), [#allocation4], 1024  }
  0x12   : > { %885 = vsyncadd (%p971_p4), [#allocation4], 4294966272 }
  0x13   : > { %887 = dma.done.wait (%p971_p4), [#allocation6], 1024  }
  0x14   : > { %889 = vsyncadd (%p971_p4), [#allocation6], 4294966272  ;;  %v748_v0 = vld [vmem:[#allocation3 + $0x38] sm:$0xff]  ;;  %v747_v1 = vld [vmem:[#allocation3 + $0x30] sm:$0xff]  ;;  %p335_p7 = scmp.lt.s32.totalorder %s892_s24, 1 }
  0x15   : > { %423 = vmatpush.bf16.msra.mxu0 %v748_v0  ;;  %v746_v2 = vld [vmem:[#allocation3 + $0x28] sm:$0xff]  ;;  %v745_v3 = vld [vmem:[#allocation3 + $0x20] sm:$0xff]  ;;  %v744_v4 = vld [vmem:[#allocation3 + $0x18] sm:$0xff] }
  0x16   : > { %s1046_s24 = smov (!%p335_p7, %s892_s24), 1  ;;  %v743_v5 = vld [vmem:[#allocation3 + $0x10] sm:$0xff]  ;;  %v742_v6 = vld [vmem:[#allocation3 + $0x8] sm:$0xff]  ;;  %v741_v7 = vld [vmem:[#allocation3] sm:$0xff] }
  0x17   : > { %s673_s20 = sshll.u32 %s1046_s24, 3  ;;  %v804_v10 = vld [vmem:[%s1033_s2] ss:$0 sm:$0xff]  ;;  %v755_v19 = vld [vmem:[#allocation5 + $0x30] sm:$0xff]  ;;  %v754_v20 = vld [vmem:[#allocation5 + $0x28] sm:$0xff] }
  0x18   : > { %s338_s23 = scalar_lea.vmem %s1031_s0, %s673_s20  ;;  %v756_v18 = vld [vmem:[#allocation5 + $0x38] sm:$0xff]  ;;  %v753_v21 = vld [vmem:[#allocation5 + $0x20] sm:$0xff]  ;;  %v751_v24 = vld [vmem:[#allocation5 + $0x10] sm:$0xff]  ;;  %s348_s15 = scalar_lea.vmem %s1038_s7, %s673_s20 }
  0x19   : > { %424 = vmatpush.bf16.msra.mxu0 %v747_v1  ;;  %v353_v8 = vld [vmem:[%s338_s23] sm:$0xff]  ;;  %541 = vmatpush.bf16.msra.mxu1 %v756_v18  ;;  %v750_v28 = vld [vmem:[#allocation5 + $0x8] sm:$0xff] }
  0x1a   : > { %v354_v9 = vpack.c.bf16 %v353_v8, %v353_v8  ;;  %v752_v22 = vld [vmem:[#allocation5 + $0x18] sm:$0xff]  ;;  %v749_v30 = vld [vmem:[#allocation5] sm:$0xff] }
  0x1b   : > { %v805_v37 = vld [vmem:[%s1034_s3] ss:$0 sm:$0xff] }
  0x1c   : > { %v806_v40 = vld [vmem:[%s1035_s4] ss:$0 sm:$0xff] }
  0x1d   : > { %425 = vmatpush.bf16.msra.mxu0 %v746_v2  ;;  %542 = vmatpush.bf16.msra.mxu1 %v755_v19  ;;  %v807_v47 = vld [vmem:[%s1037_s6] ss:$0 sm:$0xff] }
  0x21   : > { %426 = vmatpush.bf16.msra.mxu0 %v745_v3  ;;  %543 = vmatpush.bf16.msra.mxu1 %v754_v20 }
  0x25   : > { %427 = vmatpush.bf16.msra.mxu0 %v744_v4  ;;  %544 = vmatpush.bf16.msra.mxu1 %v753_v21 }
  0x29   : > { %428 = vmatpush.bf16.msra.mxu0 %v743_v5  ;;  %545 = vmatpush.bf16.msra.mxu1 %v752_v22 }
  0x2d   : > { %429 = vmatpush.bf16.msra.mxu0 %v742_v6  ;;  %546 = vmatpush.bf16.msra.mxu1 %v751_v24 }
  0x31   : > { %430 = vmatpush.bf16.msra.mxu0 %v741_v7  ;;  %547 = vmatpush.bf16.msra.mxu1 %v750_v28 }
  0x34   : > { %431 = vmatmul.bf16.vlgmr.msra.gmra.mxu0 %v354_v9 }
  0x35   : > { %548 = vmatpush.bf16.msra.mxu1 %v749_v30 }
  0xb1   : > { %v432_v11 = vpop.f32.mrf.mxu0 }
  0xb2   : > { %v433_v12 = vadd.f32 %v804_v10, %v432_v11 }
  0xb4   : > { %436 = vadd.xlane.f32.xlu0 %v433_v12 }
  0xb9   : > { %v434_v13 = vpop.f32.mrf.mxu0 }
 0x127   : > { %v437_v14 = vpop.xlane.xlu0 %436 }
 0x128   : > { %v438_v15 = vmul.f32 0.03125, %v437_v14 }
 0x12a   : > { %v439_v16 = vsub.f32 %v433_v12, %v438_v15  ;;  %v443_v23 = vmul.f32 %v438_v15, %v438_v15 }
 0x12c   : > { %v440_v17 = vmul.f32 %v439_v16, %v439_v16  ;;  %v444_v25 = vmul.f32 96.0, %v443_v23 }
 0x12e   : > { %441 = vadd.xlane.f32.xlu0 %v440_v17 }
 0x1a1   : > { %v442_v26 = vpop.xlane.xlu0 %441 }
 0x1a2   : > { %v445_v27 = vsub.f32 %v442_v26, %v444_v25 }
 0x1a4   : > { %v446_v29 = vmul.f32 0.03125, %v445_v27 }
 0x1a6   : > { %v447_v31 = vadd.f32 1e-05, %v446_v29 }
 0x1a8   : > { %808 = vrsqrt.f32 %v447_v31  ;;  %vm454_vm1 = vweird.f32 %v447_v31 }
 0x1ae   : > { %v809_v32 = vpop.eup %808 }
 0x1af   : > { %v449_v33 = vmul.f32 %v809_v32, %v447_v31  ;;  %vm455_vm0 = vweird.f32 %v809_v32 }
 0x1b0   : > { %vm456_vm2 = vmor %vm454_vm1, %vm455_vm0 }
 0x1b1   : > { %v450_v34 = vmul.f32 %v809_v32, %v449_v33 }
 0x1b3   : > { %v451_v35 = vmul.f32 0.5, %v450_v34 }
 0x1b5   : > { %v452_v36 = vsub.f32 1.5, %v451_v35 }
 0x1b7   : > { %v453_v38 = vmul.f32 %v809_v32, %v452_v36 }
 0x1b9   : > { %v457_v39 = vsel %vm456_vm2, %v809_v32, %v453_v38 }
 0x1ba   : > { %v462_v41 = vmul.f32 %v805_v37, %v457_v39 }
 0x1bc   : > { %v463_v42 = vmul.f32 %v462_v41, %v439_v16 }
 0x1be   : > { %v468_v43 = vadd.f32 %v806_v40, %v463_v42 }
 0x1c0   : > { %v469_v44 = vmax.f32 %v468_v43, 0.0 }
 0x1c2   : > { %v470_v45 = vpack.c.bf16 %v469_v44, %v469_v44 }
 0x1c4   : > { %471 = vst [vmem:[#allocation2] sm:$0xf] %v470_v45 }
 0x1cb   : > { %v472_v46 = vld [vmem:[#allocation2] sm:$0xf] }
 0x1cc   : > { %549 = vmatmul.bf16.vlgmr.msra.gmra.mxu1 %v472_v46 }
 0x249   : > { %v550_v48 = vpop.f32.mrf.mxu1 }
 0x24a   : > { %v551_v49 = vadd.f32 %v807_v47, %v550_v48 }
 0x24c   : > { %554 = vst [vmem:[%s348_s15] sm:$0xff] %v551_v49 }
 0x251   : > { %v552_v50 = vpop.f32.mrf.mxu1 }
 0x252 PF: > { %s19_s26 = sadd.s32 1, %s900_s26   ;;  %s1041_s24 = smov %s896_s25 }
 0x253   : > { %p16_p8 = scmp.ge.s32.totalorder %s19_s26, 4   ;;  %s1042_s25 = smov %s1044_s28 }
 0x255   :  { %18 = sbr.rel (!%p16_p8) target bundleno = 3 (0x3), region = 95 }
 0x25a   :  { %580 = vsyncpa [#allocation4], 1 }
 0x25b   :  { %582 = vsyncpa [#allocation4 + $0x1], 1 }
 0x25c   :  { %583 = vsyncpa [#allocation6], 1 }

</bundles_post_ra>
